<compile_context>
chip_gen: v5e
topology: v5e:2x2
jax: 0.10.0
libtpu: 0.0.40
codegen_flags: <defaults>
</compile_context>

<pallas_src>
import functools
import math

import jax
import jax.numpy as jnp
from jax import lax
from jax.experimental import pallas as pl
from jax.experimental.pallas import tpu as pltpu

_LANES = 128
_SUBLANES = 8
_TILE = _SUBLANES * _LANES  # 1024-element granularity handled by the kernel


def _device_tuning():
    """(max_block_rows, num_splits, vmem_limit_bytes) per TPU generation."""
    try:
        kind = jax.devices()[0].device_kind.lower()
    except Exception:
        kind = ""
    if "v7" in kind:
        # 2 TensorCores, 64 MiB physical VMEM/TC: big blocks + 2-way split.
        return 8192, 2, 48 * 1024 * 1024
    if "v6" in kind:
        # 1 TC, 128 MiB physical VMEM: 4 MiB f32 blocks, ample headroom.
        return 8192, 1, 64 * 1024 * 1024
    if "v5" in kind:
        # v5e: 16 MiB default scoped VMEM, single vst slot -> smaller blocks.
        return 4096, 1, 32 * 1024 * 1024
    # Unknown backend (CPU interpret, future chips): conservative defaults.
    return 2048, 1, None


def _context_loss_kernel(g_ref, c_ref, m_ref, abs_out, mask_out, *,
                         block_rows, blocks_per_split, total_rows):
    p = pl.program_id(0)          # "parallel" split axis (both TCs on v7x)
    k = pl.program_id(1)          # "arbitrary" reduction axis

    # Output blocks double as (8, 128) accumulators (same block index for all k).
    @pl.when(k == 0)
    def _():
        abs_out[...] = jnp.zeros_like(abs_out)
        mask_out[...] = jnp.zeros_like(mask_out)

    g = g_ref[...].astype(jnp.float32)
    c = c_ref[...].astype(jnp.float32)
    m = m_ref[...].astype(jnp.float32)

    groups = block_rows // _SUBLANES

    def _tree_sum(x):
        # vreg-aligned pairwise reduction (groups, 8, 128) -> (8, 128):
        # pure VPU adds across whole vregs, no cross-lane (XLU) work in the loop.
        return jnp.sum(x.reshape(groups, _SUBLANES, _LANES), axis=0)

    row_start = (p * blocks_per_split + k) * block_rows
    rows_left = total_rows - row_start            # <= 0 for clamped dead slots

    @pl.when(rows_left >= block_rows)             # full block: mask-free hot path
    def _():
        abs_out[...] += _tree_sum(jnp.abs(g - c))
        mask_out[...] += _tree_sum(m)

    @pl.when(rows_left < block_rows)              # ragged final block / dead slot
    def _():
        row_ids = lax.broadcasted_iota(jnp.int32, (block_rows, _LANES), 0)
        valid = row_ids < rows_left
        abs_out[...] += _tree_sum(jnp.where(valid, jnp.abs(g - c), 0.0))
        mask_out[...] += _tree_sum(jnp.where(valid, m, 0.0))


def _partial_sums(g2, c2, m2):
    """Pallas reduction over a (rows, 128) view; rows is a multiple of 8.

    Returns (sum(|g - c|), sum(mask)) over the view as f32 scalars.
    """
    rows = g2.shape[0]
    max_rows, num_splits, vmem_limit = _device_tuning()

    block_rows = min(max_rows, rows)              # both multiples of 8
    total_blocks = pl.cdiv(rows, block_rows)
    if total_blocks < num_splits:
        num_splits = 1
    blocks_per_split = pl.cdiv(total_blocks, num_splits)

    def in_map(p, k):
        # Clamp so dead grid slots (ragged split) never index past the array;
        # their contribution is zeroed by the in-kernel row mask.
        return (jnp.minimum(p * blocks_per_split + k, total_blocks - 1), 0)

    in_spec = pl.BlockSpec((block_rows, _LANES), in_map)
    out_spec = pl.BlockSpec((_SUBLANES, _LANES), lambda p, k: (p, 0))

    kernel = functools.partial(
        _context_loss_kernel,
        block_rows=block_rows,
        blocks_per_split=blocks_per_split,
        total_rows=rows,
    )

    n_main = rows * _LANES
    cost = pl.CostEstimate(
        flops=3 * n_main, transcendentals=0,
        bytes_accessed=n_main * (g2.dtype.itemsize + c2.dtype.itemsize
                                 + m2.dtype.itemsize))

    compiler_kwargs = dict(dimension_semantics=("parallel", "arbitrary"))
    if vmem_limit is not None:
        compiler_kwargs["vmem_limit_bytes"] = vmem_limit

    abs_part, mask_part = pl.pallas_call(
        kernel,
        out_shape=(
            jax.ShapeDtypeStruct((num_splits * _SUBLANES, _LANES), jnp.float32),
            jax.ShapeDtypeStruct((num_splits * _SUBLANES, _LANES), jnp.float32),
        ),
        grid=(num_splits, blocks_per_split),
        in_specs=[in_spec, in_spec, in_spec],
        out_specs=(out_spec, out_spec),
        compiler_params=pltpu.CompilerParams(**compiler_kwargs),
        cost_estimate=cost,
    )(g2, c2, m2)

    return jnp.sum(abs_part), jnp.sum(mask_part)


@jax.jit
def context_loss(generated, corrupted, weight_mask):
    assert generated.shape == corrupted.shape == weight_mask.shape
    n = math.prod(generated.shape)

    g = jnp.reshape(generated, (-1,))
    c = jnp.reshape(corrupted, (-1,))
    m = jnp.reshape(weight_mask, (-1,))

    # Kernel handles the largest 1024-aligned prefix (rows % 8 == 0, no padding
    # copy, no undefined trailing rows); the <1024-element tail is folded in
    # with a tiny jnp reduction.
    n_main = (n // _TILE) * _TILE

    abs_sum = jnp.float32(0.0)
    mask_sum = jnp.float32(0.0)

    if n_main > 0:
        rows = n_main // _LANES
        if n_main == n:
            g2, c2, m2 = (jnp.reshape(x, (rows, _LANES)) for x in (g, c, m))
        else:
            g2, c2, m2 = (jnp.reshape(x[:n_main], (rows, _LANES))
                          for x in (g, c, m))
        a, mm = _partial_sums(g2, c2, m2)
        abs_sum = abs_sum + a
        mask_sum = mask_sum + mm

    if n_main < n:
        gt = g[n_main:].astype(jnp.float32)
        ct = c[n_main:].astype(jnp.float32)
        mt = m[n_main:].astype(jnp.float32)
        abs_sum = abs_sum + jnp.sum(jnp.abs(gt - ct))
        mask_sum = mask_sum + jnp.sum(mt)

    inv_n = jnp.float32(1.0 / n)
    l1 = abs_sum * inv_n            # mean(|generated - corrupted|)
    mean_mask = mask_sum * inv_n    # mean(weight_mask)
    # TODO(synk): if weight_mask is fixed across calls (typical inpainting mask),
    # cache mean(weight_mask) once and drop it from the streamed inputs
    # (~1.5x fewer HBM bytes for this bandwidth-bound kernel).
    return l1 * mean_mask


def _reference(generated, corrupted, weight_mask):
    l1 = jnp.mean(jnp.abs(generated - corrupted))
    return jnp.mean(l1 * weight_mask)


if __name__ == "__main__":
    key = jax.random.PRNGKey(0)
    k1, k2, k3, k4, k5, k6 = jax.random.split(key, 6)

    # NCHW, 1024-aligned path: 2*4*16*16 = 2048 elements.
    shape = (2, 4, 16, 16)
    generated = jax.random.normal(k1, shape, dtype=jnp.float32)
    corrupted = jax.random.normal(k2, shape, dtype=jnp.float32)
    weight_mask = (jax.random.uniform(k3, shape) > 0.5).astype(jnp.float32)

    out = jax.block_until_ready(context_loss(generated, corrupted, weight_mask))
    ref = _reference(generated, corrupted, weight_mask)
    # rtol accounts for f32 reduction-order differences vs. the XLA reference.
    assert jnp.allclose(out, ref, rtol=1e-4, atol=1e-6), (out, ref)

    # Unaligned shape: 3*4*11*9 = 1188 elements -> 1024 through the kernel,
    # 164-element tail folded in via the jnp path (no padding copy).
    shape2 = (3, 4, 11, 9)
    g_u = jax.random.normal(k4, shape2, dtype=jnp.float32)
    c_u = jax.random.normal(k5, shape2, dtype=jnp.float32)
    m_u = (jax.random.uniform(k6, shape2) > 0.5).astype(jnp.float32)

    out2 = jax.block_until_ready(context_loss(g_u, c_u, m_u))
    ref2 = _reference(g_u, c_u, m_u)
    assert jnp.allclose(out2, ref2, rtol=1e-4, atol=1e-6), (out2, ref2)

    print("KERNEL_OK")
</pallas_src>

<mosaic_0001>
module attributes {stable_mosaic.version = 11 : i64} {
  func.func @_context_loss_kernel(%arg0: i32, %arg1: i32, %arg2: memref<16x128xf32, #tpu.memory_space<vmem>>, %arg3: memref<16x128xf32, #tpu.memory_space<vmem>>, %arg4: memref<16x128xf32, #tpu.memory_space<vmem>>, %arg5: memref<8x128xf32, #tpu.memory_space<vmem>>, %arg6: memref<8x128xf32, #tpu.memory_space<vmem>>) attributes {dimension_semantics = [#tpu.dimension_semantics<parallel>, #tpu.dimension_semantics<arbitrary>], iteration_bounds = array<i64: 1, 1>, scalar_prefetch = 0 : i64, scratch_operands = 0 : i64, tpu.core_type = #tpu.core_type<tc>, window_params = [{transform_indices = @transform_0, window_bounds = array<i64: 16, 128>}, {transform_indices = @transform_1, window_bounds = array<i64: 16, 128>}, {transform_indices = @transform_2, window_bounds = array<i64: 16, 128>}, {transform_indices = @transform_3, window_bounds = array<i64: 8, 128>}, {transform_indices = @transform_4, window_bounds = array<i64: 8, 128>}]} {
    %c0_i32 = arith.constant 0 : i32
    %0 = arith.cmpi eq, %arg1, %c0_i32 : i32
    %1 = arith.extui %0 : i1 to i32
    %c0_i32_0 = arith.constant 0 : i32
    %2 = arith.cmpi ne, %1, %c0_i32_0 : i32
    scf.if %2 {
      %cst = arith.constant 0.000000e+00 : f32
      %16 = vector.broadcast %cst : f32 to vector<8x128xf32>
      %c0_11 = arith.constant 0 : index
      %c0_12 = arith.constant 0 : index
      %17 = vector.load %arg5[%c0_11, %c0_12] : memref<8x128xf32, #tpu.memory_space<vmem>>, vector<8x128xf32>
      tpu.vector_store %arg5[%c0_11, %c0_12], %16 {strides = array<i32>} : memref<8x128xf32, #tpu.memory_space<vmem>>, vector<8x128xf32>,
      %cst_13 = arith.constant 0.000000e+00 : f32
      %18 = vector.broadcast %cst_13 : f32 to vector<8x128xf32>
      %c0_14 = arith.constant 0 : index
      %c0_15 = arith.constant 0 : index
      %19 = vector.load %arg6[%c0_14, %c0_15] : memref<8x128xf32, #tpu.memory_space<vmem>>, vector<8x128xf32>
      tpu.vector_store %arg6[%c0_14, %c0_15], %18 {strides = array<i32>} : memref<8x128xf32, #tpu.memory_space<vmem>>, vector<8x128xf32>,
    } else {
    }
    %c0 = arith.constant 0 : index
    %c0_1 = arith.constant 0 : index
    %3 = vector.load %arg2[%c0, %c0_1] : memref<16x128xf32, #tpu.memory_space<vmem>>, vector<16x128xf32>
    %c0_2 = arith.constant 0 : index
    %c0_3 = arith.constant 0 : index
    %4 = vector.load %arg3[%c0_2, %c0_3] : memref<16x128xf32, #tpu.memory_space<vmem>>, vector<16x128xf32>
    %c0_4 = arith.constant 0 : index
    %c0_5 = arith.constant 0 : index
    %5 = vector.load %arg4[%c0_4, %c0_5] : memref<16x128xf32, #tpu.memory_space<vmem>>, vector<16x128xf32>
    %c1_i32 = arith.constant 1 : i32
    %6 = arith.muli %arg0, %c1_i32 : i32
    %7 = arith.addi %6, %arg1 : i32
    %c16_i32 = arith.constant 16 : i32
    %8 = arith.muli %7, %c16_i32 : i32
    %c16_i32_6 = arith.constant 16 : i32
    %9 = arith.subi %c16_i32_6, %8 : i32
    %c16_i32_7 = arith.constant 16 : i32
    %10 = arith.cmpi sge, %9, %c16_i32_7 : i32
    %11 = arith.extui %10 : i1 to i32
    %c0_i32_8 = arith.constant 0 : i32
    %12 = arith.cmpi ne, %11, %c0_i32_8 : i32
    scf.if %12 {
      %c0_11 = arith.constant 0 : index
      %c0_12 = arith.constant 0 : index
      %16 = vector.load %arg5[%c0_11, %c0_12] : memref<8x128xf32, #tpu.memory_space<vmem>>, vector<8x128xf32>
      %17 = arith.subf %3, %4 : vector<16x128xf32>
      %18 = math.absf %17 : vector<16x128xf32>
      %19 = vector.shape_cast %18 : vector<16x128xf32> to vector<2x8x128xf32>
      %cst = arith.constant dense<0.000000e+00> : vector<8x128xf32>
      %20 = vector.multi_reduction <add>, %19, %cst [0] : vector<2x8x128xf32> to vector<8x128xf32>
      %21 = arith.addf %16, %20 : vector<8x128xf32>
      %c0_13 = arith.constant 0 : index
      %c0_14 = arith.constant 0 : index
      %22 = vector.load %arg5[%c0_13, %c0_14] : memref<8x128xf32, #tpu.memory_space<vmem>>, vector<8x128xf32>
      tpu.vector_store %arg5[%c0_13, %c0_14], %21 {strides = array<i32>} : memref<8x128xf32, #tpu.memory_space<vmem>>, vector<8x128xf32>,
      %c0_15 = arith.constant 0 : index
      %c0_16 = arith.constant 0 : index
      %23 = vector.load %arg6[%c0_15, %c0_16] : memref<8x128xf32, #tpu.memory_space<vmem>>, vector<8x128xf32>
      %24 = vector.shape_cast %5 : vector<16x128xf32> to vector<2x8x128xf32>
      %cst_17 = arith.constant dense<0.000000e+00> : vector<8x128xf32>
      %25 = vector.multi_reduction <add>, %24, %cst_17 [0] : vector<2x8x128xf32> to vector<8x128xf32>
      %26 = arith.addf %23, %25 : vector<8x128xf32>
      %c0_18 = arith.constant 0 : index
      %c0_19 = arith.constant 0 : index
      %27 = vector.load %arg6[%c0_18, %c0_19] : memref<8x128xf32, #tpu.memory_space<vmem>>, vector<8x128xf32>
      tpu.vector_store %arg6[%c0_18, %c0_19], %26 {strides = array<i32>} : memref<8x128xf32, #tpu.memory_space<vmem>>, vector<8x128xf32>,
    } else {
    }
    %c16_i32_9 = arith.constant 16 : i32
    %13 = arith.cmpi slt, %9, %c16_i32_9 : i32
    %14 = arith.extui %13 : i1 to i32
    %c0_i32_10 = arith.constant 0 : i32
    %15 = arith.cmpi ne, %14, %c0_i32_10 : i32
    scf.if %15 {
      %16 = tpu.iota {dimensions = array<i32: 0>} : vector<16x128xi32>
      %17 = vector.broadcast %9 : i32 to vector<16x128xi32>
      %18 = arith.cmpi slt, %16, %17 : vector<16x128xi32>
      %c0_11 = arith.constant 0 : index
      %c0_12 = arith.constant 0 : index
      %19 = vector.load %arg5[%c0_11, %c0_12] : memref<8x128xf32, #tpu.memory_space<vmem>>, vector<8x128xf32>
      %20 = arith.subf %3, %4 : vector<16x128xf32>
      %21 = math.absf %20 : vector<16x128xf32>
      %cst = arith.constant 0.000000e+00 : f32
      %22 = vector.broadcast %cst : f32 to vector<16x128xf32>
      %23 = arith.select %18, %21, %22 : vector<16x128xi1>, vector<16x128xf32>
      %24 = vector.shape_cast %23 : vector<16x128xf32> to vector<2x8x128xf32>
      %cst_13 = arith.constant dense<0.000000e+00> : vector<8x128xf32>
      %25 = vector.multi_reduction <add>, %24, %cst_13 [0] : vector<2x8x128xf32> to vector<8x128xf32>
      %26 = arith.addf %19, %25 : vector<8x128xf32>
      %c0_14 = arith.constant 0 : index
      %c0_15 = arith.constant 0 : index
      %27 = vector.load %arg5[%c0_14, %c0_15] : memref<8x128xf32, #tpu.memory_space<vmem>>, vector<8x128xf32>
      tpu.vector_store %arg5[%c0_14, %c0_15], %26 {strides = array<i32>} : memref<8x128xf32, #tpu.memory_space<vmem>>, vector<8x128xf32>,
      %c0_16 = arith.constant 0 : index
      %c0_17 = arith.constant 0 : index
      %28 = vector.load %arg6[%c0_16, %c0_17] : memref<8x128xf32, #tpu.memory_space<vmem>>, vector<8x128xf32>
      %cst_18 = arith.constant 0.000000e+00 : f32
      %29 = vector.broadcast %cst_18 : f32 to vector<16x128xf32>
      %30 = arith.select %18, %5, %29 : vector<16x128xi1>, vector<16x128xf32>
      %31 = vector.shape_cast %30 : vector<16x128xf32> to vector<2x8x128xf32>
      %cst_19 = arith.constant dense<0.000000e+00> : vector<8x128xf32>
      %32 = vector.multi_reduction <add>, %31, %cst_19 [0] : vector<2x8x128xf32> to vector<8x128xf32>
      %33 = arith.addf %28, %32 : vector<8x128xf32>
      %c0_20 = arith.constant 0 : index
      %c0_21 = arith.constant 0 : index
      %34 = vector.load %arg6[%c0_20, %c0_21] : memref<8x128xf32, #tpu.memory_space<vmem>>, vector<8x128xf32>
      tpu.vector_store %arg6[%c0_20, %c0_21], %33 {strides = array<i32>} : memref<8x128xf32, #tpu.memory_space<vmem>>, vector<8x128xf32>,
    } else {
    }
    return
  }
  func.func @transform_0(%arg0: i32, %arg1: i32) -> (i32, i32) {
    %c1_i32 = arith.constant 1 : i32
    %0 = arith.muli %arg0, %c1_i32 : i32
    %1 = arith.addi %0, %arg1 : i32
    %c0_i32 = arith.constant 0 : i32
    %2 = arith.minsi %1, %c0_i32 : i32
    %c0_i32_0 = arith.constant 0 : i32
    %c0_i32_1 = arith.constant 0 : i32
    return %2, %c0_i32_0 : i32, i32
  }
  func.func @transform_1(%arg0: i32, %arg1: i32) -> (i32, i32) {
    %c1_i32 = arith.constant 1 : i32
    %0 = arith.muli %arg0, %c1_i32 : i32
    %1 = arith.addi %0, %arg1 : i32
    %c0_i32 = arith.constant 0 : i32
    %2 = arith.minsi %1, %c0_i32 : i32
    %c0_i32_0 = arith.constant 0 : i32
    %c0_i32_1 = arith.constant 0 : i32
    return %2, %c0_i32_0 : i32, i32
  }
  func.func @transform_2(%arg0: i32, %arg1: i32) -> (i32, i32) {
    %c1_i32 = arith.constant 1 : i32
    %0 = arith.muli %arg0, %c1_i32 : i32
    %1 = arith.addi %0, %arg1 : i32
    %c0_i32 = arith.constant 0 : i32
    %2 = arith.minsi %1, %c0_i32 : i32
    %c0_i32_0 = arith.constant 0 : i32
    %c0_i32_1 = arith.constant 0 : i32
    return %2, %c0_i32_0 : i32, i32
  }
  func.func @transform_3(%arg0: i32, %arg1: i32) -> (i32, i32) {
    %c0_i32 = arith.constant 0 : i32
    %c0_i32_0 = arith.constant 0 : i32
    return %arg0, %c0_i32 : i32, i32
  }
  func.func @transform_4(%arg0: i32, %arg1: i32) -> (i32, i32) {
    %c0_i32 = arith.constant 0 : i32
    %c0_i32_0 = arith.constant 0 : i32
    return %arg0, %c0_i32 : i32, i32
  }
}

</mosaic_0001>

<bundles_post_ra>
// kernel: context_loss.1
= control target key start
LH: loop header
LB: loop body
LE: loop exit
PB: predicated region body
PF: predicated region fallthrough
CT: control target
= control target key end

     0   :  { %s245_s0 = inlined_call_operand.vmem [shape: f32[16,128], index: 0, kind: input, shape index: {}]   ;;  %s246_s1 = inlined_call_operand.vmem [shape: f32[16,128], index: 1, kind: input, shape index: {}]   ;;  %s247_s2 = inlined_call_operand.vmem [shape: f32[16,128], index: 2, kind: input, shape index: {}]   ;;  %s248_s4 = inlined_call_operand.vmem [shape: f32[8,128], index: 4, kind: output, shape index: {1}]   ;;  %s249_s3 = inlined_call_operand.vmem [shape: f32[8,128], index: 3, kind: output, shape index: {0}]  }
   0x1   :  { %v118_v0 = vld [vmem:[%s245_s0] sm:$0xff]  ;;  %v119_v1 = vld [vmem:[%s245_s0 + $0x8] sm:$0xff] }
   0x2   :  { %v120_v2 = vld [vmem:[%s246_s1] sm:$0xff]  ;;  %v121_v3 = vld [vmem:[%s246_s1 + $0x8] sm:$0xff] }
   0x3   :  { %v132_v4 = vsub.f32 %v118_v0, %v120_v2  ;;  %v122_v5 = vld [vmem:[%s247_s2] sm:$0xff]  ;;  %v123_v6 = vld [vmem:[%s247_s2 + $0x8] sm:$0xff]  ;;  %v133_v7 = vsub.f32 %v119_v1, %v121_v3 }
   0x4   :  { %v140_v8 = vadd.f32 %v123_v6, %v122_v5 }
   0x5   :  { %v134_v9 = vand.u32 2147483647, %v132_v4  ;;  %v135_v10 = vand.u32 2147483647, %v133_v7 }
   0x6   :  { %142 = vst [vmem:[%s248_s4] sm:$0xff] %v140_v8 }
   0x7   :  { %v136_v11 = vadd.f32 %v135_v10, %v134_v9 }
   0x9   :  { %138 = vst [vmem:[%s249_s3] sm:$0xff] %v136_v11 }

</bundles_post_ra>
